<compile_context>
chip_gen: v7x
topology: tpu7x:2x2x1
jax: 0.10.0
libtpu: 0.0.40
codegen_flags: <defaults>
</compile_context>

<pallas_src>
import jax
import jax.numpy as jnp
from jax.experimental import pallas as pl
from jax.experimental.pallas import tpu as pltpu


def _rq_fused_kernel(s_ref, a_ref, w1_ref, b1_ref, w2_ref, b2_ref,
                     w3_ref, b3_ref, q_ref, xu_ref):
    """Both critic heads: 3 lane-dense bf16 MXU matmuls, f32 accumulate."""
    S = s_ref.shape[1]
    # Layer 1: build concat([state, action]) in a VMEM scratch (two stores),
    # then ONE dot against the host-packed [S+A, 2*H1] weight.
    xu_ref[:, :S] = s_ref[...]
    xu_ref[:, S:] = a_ref[...]
    h = jnp.dot(xu_ref[...].astype(jnp.bfloat16), w1_ref[...],
                preferred_element_type=jnp.float32)
    h = jnp.maximum(h + b1_ref[...], 0.0)            # f32 elementwise (v5e-safe)
    # Layer 2: block-diagonal -> both heads at once, full 128-lane width.
    h = jnp.dot(h.astype(jnp.bfloat16), w2_ref[...],
                preferred_element_type=jnp.float32)
    h = jnp.maximum(h + b2_ref[...], 0.0)
    # Layer 3: [q1 | q2] in a single (tb, 2) tile (kept 2-wide on purpose:
    # writeback is only 8 B/row; padding to 128 lanes would be a regression).
    q = jnp.dot(h.astype(jnp.bfloat16), w3_ref[...],
                preferred_element_type=jnp.float32)
    q_ref[...] = (q + b3_ref[...]).astype(q_ref.dtype)


def _round_up(x, m):
    return ((x + m - 1) // m) * m


@jax.jit
def rq_network_forward(state, action, fused):
    """Pallas-backed RQNetwork forward.

    state: [B, S] f32, action: [B, A] f32, fused: dict from pack_rq_fused().
    Returns (q1, q2), each [B, 1] f32.
    """
    B, S = state.shape
    A = action.shape[1]
    w1, b1 = fused["w1"], fused["b1"]
    w2, b2 = fused["w2"], fused["b2"]
    w3, b3 = fused["w3"], fused["b3"]
    Hf1 = w1.shape[1]   # 2 * fc1_units
    Hf2 = w2.shape[1]   # 2 * fc2_units

    # Batch tiling: weights stay VMEM-resident (constant index_maps) while
    # activations stream in tb-row blocks.  nb >= 2 for B > 256 so the
    # "parallel" axis shards across v7x's two TensorCores; tb is rounded to 8
    # so the tail padding is at most a few rows, never a full block.
    TB_MAX = 512
    nb = 1 if B <= 256 else max(2, pl.cdiv(B, TB_MAX))
    tb = _round_up(pl.cdiv(B, nb), 8)
    Bp = nb * tb
    if Bp != B:
        state = jnp.pad(state, ((0, Bp - B), (0, 0)))
        action = jnp.pad(action, ((0, Bp - B), (0, 0)))

    flops = 2 * Bp * ((S + A) * Hf1 + Hf1 * Hf2 + Hf2 * 2)
    param_bytes = sum(int(x.size) * x.dtype.itemsize
                      for x in (w1, b1, w2, b2, w3, b3))
    bytes_accessed = param_bytes + Bp * (S + A + 2) * 4

    q = pl.pallas_call(
        _rq_fused_kernel,
        out_shape=jax.ShapeDtypeStruct((Bp, 2), jnp.float32),
        grid=(nb,),
        in_specs=[
            pl.BlockSpec((tb, S), lambda i: (i, 0)),      # state block
            pl.BlockSpec((tb, A), lambda i: (i, 0)),      # action block
            pl.BlockSpec(w1.shape, lambda i: (0, 0)),     # fused weights: resident
            pl.BlockSpec(b1.shape, lambda i: (0, 0)),
            pl.BlockSpec(w2.shape, lambda i: (0, 0)),
            pl.BlockSpec(b2.shape, lambda i: (0, 0)),
            pl.BlockSpec(w3.shape, lambda i: (0, 0)),
            pl.BlockSpec(b3.shape, lambda i: (0, 0)),
        ],
        out_specs=pl.BlockSpec((tb, 2), lambda i: (i, 0)),
        scratch_shapes=[pltpu.VMEM((tb, S + A), jnp.float32)],
        compiler_params=pltpu.CompilerParams(
            dimension_semantics=("parallel",)),
        cost_estimate=pl.CostEstimate(
            flops=flops, transcendentals=0, bytes_accessed=bytes_accessed),
    )(state, action, w1, b1, w2, b2, w3, b3)

    q = q[:B]
    return q[:, 0:1], q[:, 1:2]


def init_rq_params(key, state_size, action_size, fc1_units=64, fc2_units=64):
    """Per-layer params mimicking nn.Linear default init (uniform +-1/sqrt(fan_in)).

    Weights stored transposed as [in_features, out_features]; biases as [1, out].
    """
    in_dim = state_size + action_size
    dims = [
        ("w1", "b1", in_dim, fc1_units),
        ("w2", "b2", fc1_units, fc2_units),
        ("w3", "b3", fc2_units, 1),
        ("w4", "b4", in_dim, fc1_units),
        ("w5", "b5", fc1_units, fc2_units),
        ("w6", "b6", fc2_units, 1),
    ]
    params = {}
    for wname, bname, fan_in, fan_out in dims:
        key, kw, kb = jax.random.split(key, 3)
        bound = 1.0 / jnp.sqrt(jnp.float32(fan_in))
        params[wname] = jax.random.uniform(
            kw, (fan_in, fan_out), jnp.float32, -bound, bound)
        params[bname] = jax.random.uniform(
            kb, (1, fan_out), jnp.float32, -bound, bound)
    return params


def pack_rq_fused(params):
    """Host-side one-time fusion of the two critic heads into 6 arrays.

    Matmul weights are stored in bf16 (MXU operands); biases stay f32 and the
    bias-add / ReLU run in f32 in-kernel (f32 accumulation throughout).
    """
    w1, w4 = params["w1"], params["w4"]
    w2, w5 = params["w2"], params["w5"]
    w3, w6 = params["w3"], params["w6"]
    H1 = w1.shape[1]
    H2 = w2.shape[1]
    # Layer-1: heads side-by-side on lanes -> [S+A, 2*H1].
    w1f = jnp.concatenate([w1, w4], axis=1).astype(jnp.bfloat16)
    b1 = jnp.concatenate([params["b1"], params["b4"]], axis=1)          # [1, 2*H1]
    # Layer-2: block-diagonal so head channels never mix.
    w2f = jnp.zeros((2 * H1, 2 * H2), jnp.float32)
    w2f = w2f.at[:H1, :H2].set(w2).at[H1:, H2:].set(w5)                 # [2*H1, 2*H2]
    w2f = w2f.astype(jnp.bfloat16)
    b2 = jnp.concatenate([params["b2"], params["b5"]], axis=1)          # [1, 2*H2]
    # Layer-3: block-diagonal into a 2-wide output [q1 | q2].
    w3f = jnp.zeros((2 * H2, 2), jnp.float32)
    w3f = w3f.at[:H2, 0:1].set(w3).at[H2:, 1:2].set(w6)                 # [2*H2, 2]
    w3f = w3f.astype(jnp.bfloat16)
    b3 = jnp.concatenate([params["b3"], params["b6"]], axis=1)          # [1, 2]
    # TODO(synk): optionally fold biases into the weights (ones-column trick)
    # to cut in_specs 8 -> 6; only a few-% DMA-setup win, skipped for clarity.
    return {"w1": w1f, "b1": b1, "w2": w2f, "b2": b2, "w3": w3f, "b3": b3}


def _reference_forward(state, action, params):
    """Pure-JAX f32 reference of RQNetwork.forward (unfused params)."""
    xu = jnp.concatenate([state, action], axis=1)
    h1 = jax.nn.relu(xu @ params["w1"] + params["b1"])
    h1 = jax.nn.relu(h1 @ params["w2"] + params["b2"])
    q1 = h1 @ params["w3"] + params["b3"]
    h2 = jax.nn.relu(xu @ params["w4"] + params["b4"])
    h2 = jax.nn.relu(h2 @ params["w5"] + params["b5"])
    q2 = h2 @ params["w6"] + params["b6"]
    return q1, q2


if __name__ == "__main__":
    state_size = 16
    action_size = 8

    key = jax.random.PRNGKey(0)
    kp, ks, ka, ks2, ka2 = jax.random.split(key, 5)

    params = init_rq_params(kp, state_size, action_size)
    fused = pack_rq_fused(params)

    # Small-batch check (single grid step, no padding).
    batch = 8
    state = jax.random.normal(ks, (batch, state_size), jnp.float32)
    action = jax.random.normal(ka, (batch, action_size), jnp.float32)
    q1, q2 = rq_network_forward(state, action, fused)
    q1 = jax.block_until_ready(q1)
    q2 = jax.block_until_ready(q2)
    r1, r2 = _reference_forward(state, action, params)
    assert q1.shape == (batch, 1) and q2.shape == (batch, 1)
    # bf16 MXU operands (f32 accumulate) => loosen tolerance vs f32 reference.
    assert jnp.allclose(q1, r1, atol=2e-2, rtol=2e-2)
    assert jnp.allclose(q2, r2, atol=2e-2, rtol=2e-2)

    # Larger-batch check (exercises nb=2 "parallel" grid + few-row tail pad).
    batch2 = 300
    state2 = jax.random.normal(ks2, (batch2, state_size), jnp.float32)
    action2 = jax.random.normal(ka2, (batch2, action_size), jnp.float32)
    p1, p2 = rq_network_forward(state2, action2, fused)
    p1 = jax.block_until_ready(p1)
    p2 = jax.block_until_ready(p2)
    s1, s2 = _reference_forward(state2, action2, params)
    assert p1.shape == (batch2, 1) and p2.shape == (batch2, 1)
    assert jnp.allclose(p1, s1, atol=2e-2, rtol=2e-2)
    assert jnp.allclose(p2, s2, atol=2e-2, rtol=2e-2)

    print("KERNEL_OK")
</pallas_src>

<mosaic_0001>
module attributes {stable_mosaic.version = 11 : i64} {
  func.func @_rq_fused_kernel(%arg0: i32, %arg1: memref<8x16xf32, #tpu.memory_space<vmem>>, %arg2: memref<8x8xf32, #tpu.memory_space<vmem>>, %arg3: memref<24x128xbf16, #tpu.memory_space<vmem>>, %arg4: memref<1x128xf32, #tpu.memory_space<vmem>>, %arg5: memref<128x128xbf16, #tpu.memory_space<vmem>>, %arg6: memref<1x128xf32, #tpu.memory_space<vmem>>, %arg7: memref<128x2xbf16, #tpu.memory_space<vmem>>, %arg8: memref<1x2xf32, #tpu.memory_space<vmem>>, %arg9: memref<8x2xf32, #tpu.memory_space<vmem>>, %arg10: memref<8x24xf32, #tpu.memory_space<vmem>>) attributes {dimension_semantics = [#tpu.dimension_semantics<parallel>], iteration_bounds = array<i64: 1>, scalar_prefetch = 0 : i64, scratch_operands = 1 : i64, tpu.core_type = #tpu.core_type<tc>, window_params = [{transform_indices = @transform_0, window_bounds = array<i64: 8, 16>}, {transform_indices = @transform_1, window_bounds = array<i64: 8, 8>}, {pipeline_mode = #tpu.pipeline_mode<synchronous>, transform_indices = @transform_2, window_bounds = array<i64: 24, 128>}, {pipeline_mode = #tpu.pipeline_mode<synchronous>, transform_indices = @transform_3, window_bounds = array<i64: 1, 128>}, {pipeline_mode = #tpu.pipeline_mode<synchronous>, transform_indices = @transform_4, window_bounds = array<i64: 128, 128>}, {pipeline_mode = #tpu.pipeline_mode<synchronous>, transform_indices = @transform_5, window_bounds = array<i64: 1, 128>}, {pipeline_mode = #tpu.pipeline_mode<synchronous>, transform_indices = @transform_6, window_bounds = array<i64: 128, 2>}, {pipeline_mode = #tpu.pipeline_mode<synchronous>, transform_indices = @transform_7, window_bounds = array<i64: 1, 2>}, {transform_indices = @transform_8, window_bounds = array<i64: 8, 2>}]} {
    %c0 = arith.constant 0 : index
    %c0_0 = arith.constant 0 : index
    %0 = vector.load %arg1[%c0, %c0_0] : memref<8x16xf32, #tpu.memory_space<vmem>>, vector<8x16xf32>
    %c0_1 = arith.constant 0 : index
    %c0_2 = arith.constant 0 : index
    %1 = vector.load %arg10[%c0_1, %c0_2] : memref<8x24xf32, #tpu.memory_space<vmem>>, vector<8x16xf32>
    tpu.vector_store %arg10[%c0_1, %c0_2], %0 {strides = array<i32>} : memref<8x24xf32, #tpu.memory_space<vmem>>, vector<8x16xf32>,
    %c0_3 = arith.constant 0 : index
    %c0_4 = arith.constant 0 : index
    %2 = vector.load %arg2[%c0_3, %c0_4] : memref<8x8xf32, #tpu.memory_space<vmem>>, vector<8x8xf32>
    %c0_5 = arith.constant 0 : index
    %c16 = arith.constant 16 : index
    %3 = vector.load %arg10[%c0_5, %c16] : memref<8x24xf32, #tpu.memory_space<vmem>>, vector<8x8xf32>
    tpu.vector_store %arg10[%c0_5, %c16], %2 {strides = array<i32>} : memref<8x24xf32, #tpu.memory_space<vmem>>, vector<8x8xf32>,
    %c0_6 = arith.constant 0 : index
    %c0_7 = arith.constant 0 : index
    %4 = vector.load %arg10[%c0_6, %c0_7] : memref<8x24xf32, #tpu.memory_space<vmem>>, vector<8x24xf32>
    %5 = arith.truncf %4 : vector<8x24xf32> to vector<8x24xbf16>
    %c0_8 = arith.constant 0 : index
    %c0_9 = arith.constant 0 : index
    %6 = vector.load %arg3[%c0_8, %c0_9] : memref<24x128xbf16, #tpu.memory_space<vmem>>, vector<24x128xbf16>
    %cst = arith.constant dense<0.000000e+00> : vector<8x128xf32>
    %7 = tpu.matmul %5, %6, %cst {dimension_numbers = #tpu.dot_dimension_numbers<[1], [0], [0], [1], [0, 0, 1, 1], [], []>} : vector<8x24xbf16>, vector<24x128xbf16>, vector<8x128xf32> -> vector<8x128xf32>
    %c0_10 = arith.constant 0 : index
    %c0_11 = arith.constant 0 : index
    %8 = vector.load %arg4[%c0_10, %c0_11] : memref<1x128xf32, #tpu.memory_space<vmem>>, vector<1x128xf32>
    %9 = vector.broadcast %8 : vector<1x128xf32> to vector<8x128xf32>
    %10 = arith.addf %7, %9 : vector<8x128xf32>
    %cst_12 = arith.constant 0.000000e+00 : f32
    %11 = vector.broadcast %cst_12 : f32 to vector<8x128xf32>
    %12 = arith.maximumf %10, %11 : vector<8x128xf32>
    %13 = arith.truncf %12 : vector<8x128xf32> to vector<8x128xbf16>
    %c0_13 = arith.constant 0 : index
    %c0_14 = arith.constant 0 : index
    %14 = vector.load %arg5[%c0_13, %c0_14] : memref<128x128xbf16, #tpu.memory_space<vmem>>, vector<128x128xbf16>
    %cst_15 = arith.constant dense<0.000000e+00> : vector<8x128xf32>
    %15 = tpu.matmul %13, %14, %cst_15 {dimension_numbers = #tpu.dot_dimension_numbers<[1], [0], [0], [1], [0, 0, 1, 1], [], []>} : vector<8x128xbf16>, vector<128x128xbf16>, vector<8x128xf32> -> vector<8x128xf32>
    %c0_16 = arith.constant 0 : index
    %c0_17 = arith.constant 0 : index
    %16 = vector.load %arg6[%c0_16, %c0_17] : memref<1x128xf32, #tpu.memory_space<vmem>>, vector<1x128xf32>
    %17 = vector.broadcast %16 : vector<1x128xf32> to vector<8x128xf32>
    %18 = arith.addf %15, %17 : vector<8x128xf32>
    %cst_18 = arith.constant 0.000000e+00 : f32
    %19 = vector.broadcast %cst_18 : f32 to vector<8x128xf32>
    %20 = arith.maximumf %18, %19 : vector<8x128xf32>
    %21 = arith.truncf %20 : vector<8x128xf32> to vector<8x128xbf16>
    %c0_19 = arith.constant 0 : index
    %c0_20 = arith.constant 0 : index
    %22 = vector.load %arg7[%c0_19, %c0_20] : memref<128x2xbf16, #tpu.memory_space<vmem>>, vector<128x2xbf16>
    %cst_21 = arith.constant dense<0.000000e+00> : vector<8x2xf32>
    %23 = tpu.matmul %21, %22, %cst_21 {dimension_numbers = #tpu.dot_dimension_numbers<[1], [0], [0], [1], [0, 0, 1, 1], [], []>} : vector<8x128xbf16>, vector<128x2xbf16>, vector<8x2xf32> -> vector<8x2xf32>
    %c0_22 = arith.constant 0 : index
    %c0_23 = arith.constant 0 : index
    %24 = vector.load %arg8[%c0_22, %c0_23] : memref<1x2xf32, #tpu.memory_space<vmem>>, vector<1x2xf32>
    %25 = vector.broadcast %24 : vector<1x2xf32> to vector<8x2xf32>
    %26 = arith.addf %23, %25 : vector<8x2xf32>
    %c0_24 = arith.constant 0 : index
    %c0_25 = arith.constant 0 : index
    %27 = vector.load %arg9[%c0_24, %c0_25] : memref<8x2xf32, #tpu.memory_space<vmem>>, vector<8x2xf32>
    tpu.vector_store %arg9[%c0_24, %c0_25], %26 {strides = array<i32>} : memref<8x2xf32, #tpu.memory_space<vmem>>, vector<8x2xf32>,
    return
  }
  func.func @transform_0(%arg0: i32) -> (i32, i32) {
    %c0_i32 = arith.constant 0 : i32
    %c0_i32_0 = arith.constant 0 : i32
    return %arg0, %c0_i32 : i32, i32
  }
  func.func @transform_1(%arg0: i32) -> (i32, i32) {
    %c0_i32 = arith.constant 0 : i32
    %c0_i32_0 = arith.constant 0 : i32
    return %arg0, %c0_i32 : i32, i32
  }
  func.func @transform_2(%arg0: i32) -> (i32, i32) {
    %c0_i32 = arith.constant 0 : i32
    %c0_i32_0 = arith.constant 0 : i32
    %c0_i32_1 = arith.constant 0 : i32
    return %c0_i32, %c0_i32_0 : i32, i32
  }
  func.func @transform_3(%arg0: i32) -> (i32, i32) {
    %c0_i32 = arith.constant 0 : i32
    %c0_i32_0 = arith.constant 0 : i32
    %c0_i32_1 = arith.constant 0 : i32
    return %c0_i32, %c0_i32_0 : i32, i32
  }
  func.func @transform_4(%arg0: i32) -> (i32, i32) {
    %c0_i32 = arith.constant 0 : i32
    %c0_i32_0 = arith.constant 0 : i32
    %c0_i32_1 = arith.constant 0 : i32
    return %c0_i32, %c0_i32_0 : i32, i32
  }
  func.func @transform_5(%arg0: i32) -> (i32, i32) {
    %c0_i32 = arith.constant 0 : i32
    %c0_i32_0 = arith.constant 0 : i32
    %c0_i32_1 = arith.constant 0 : i32
    return %c0_i32, %c0_i32_0 : i32, i32
  }
  func.func @transform_6(%arg0: i32) -> (i32, i32) {
    %c0_i32 = arith.constant 0 : i32
    %c0_i32_0 = arith.constant 0 : i32
    %c0_i32_1 = arith.constant 0 : i32
    return %c0_i32, %c0_i32_0 : i32, i32
  }
  func.func @transform_7(%arg0: i32) -> (i32, i32) {
    %c0_i32 = arith.constant 0 : i32
    %c0_i32_0 = arith.constant 0 : i32
    %c0_i32_1 = arith.constant 0 : i32
    return %c0_i32, %c0_i32_0 : i32, i32
  }
  func.func @transform_8(%arg0: i32) -> (i32, i32) {
    %c0_i32 = arith.constant 0 : i32
    %c0_i32_0 = arith.constant 0 : i32
    return %arg0, %c0_i32 : i32, i32
  }
}

</mosaic_0001>

<bundles_post_ra>
// kernel: rq_network_forward.1
= control target key start
LH: loop header
LB: loop body
LE: loop exit
PB: predicated region body
PF: predicated region fallthrough
CT: control target
= control target key end

     0   :  { %13 = vsyncpa [#allocation4], 0  ;;  %s491_s27 = smov [#allocation3]   ;;  %s645_s0 = inlined_call_operand.vmem [shape: f32[8,16], index: 0, kind: input, shape index: {}]   ;;  %s646_s1 = inlined_call_operand.hbm [shape: f32[8,8], index: 1, kind: input, shape index: {}]   ;;  %s647_s2 = inlined_call_operand.vmem [shape: bf16[24,128], index: 2, kind: input, shape index: {}]   ;;  %s648_s3 = inlined_call_operand.vmem [shape: f32[1,128], index: 3, kind: input, shape index: {}]   ;;  %s649_s4 = inlined_call_operand.vmem [shape: bf16[128,128], index: 4, kind: input, shape index: {}]   ;;  %s650_s5 = inlined_call_operand.vmem [shape: f32[1,128], index: 5, kind: input, shape index: {}]   ;;  %s651_s6 = inlined_call_operand.vmem [shape: bf16[128,2], index: 6, kind: input, shape index: {}]   ;;  %s652_s7 = inlined_call_operand.vmem [shape: f32[1,2], index: 7, kind: input, shape index: {}]   ;;  %s653_s8 = inlined_call_operand.vmem [shape: f32[8,2], index: 8, kind: output, shape index: {}]  }
   0x1   :  { %s22_s28 = sshll.u32 %s491_s27, 4  ;;  %s467_s9 = scalar_lea.hbm %s646_s1, 128  ;;  %s23_s28 = int_to_ptr.vmem [resolvable:$true] %s22_s28 }
   0x2   :  { %p468_p0 = scmp.ne.s32.totalorder %s646_s1, %s467_s9  ;;  %p471_p1 = scmp.lt.u32.totalorder %s467_s9, %s646_s1 }
   0x4   :  { %p473_p2 = pnand %p471_p1, %p468_p0 }
   0x6   :  { %476 = shalt.err (!%p473_p2)
}
   0x7   :  { %s477_s14 = scalar_lea.vmem %s23_s28, 128  ;;  %p482_p4 = scmp.lt.s32.totalorder %s23_s28, %s23_s28 }
   0x8   :  { %p478_p3 = scmp.ne.s32.totalorder %s23_s28, %s477_s14  ;;  %p483_p5 = scmp.lt.s32.totalorder %s477_s14, %s477_s14 }
   0xa   :  { %p484_p6 = por %p483_p5, %p482_p4 }
   0xc   :  { %p485_p7 = pnand %p484_p6, %p478_p3 }
   0xe   :  { %488 = shalt.err (!%p485_p7)
}
   0xf   :  { %25 = dma.hbm_to_vmem [thread:$0]  %s646_s1, 128, %s23_s28, [#allocation4]  }
  0x10   :  { %489 = dma.done.wait [#allocation4], 128  }
  0x11   :  { %490 = vsyncadd [#allocation4], 4294967168  ;;  %v492_v0 = vmov 0.0   ;;  %vm493_vm0 = vmmov 0   ;;  %vm43_vm1 = vcmask 130048   ;;  %v45_v1 = vld [vmem:[#allocation3] sm:$0xff] }
  0x12   :  { %397 = vmatprep.subr.bf16.mxu0 %v492_v0  ;;  %405 = vmatprep.subr.bf16.mxu1 %v492_v0  ;;  %v42_v2 = vld [vmem:[%s645_s0] sm:$0xff]  ;;  %s494_s1 = smov 16   ;;  %vm77_vm2 = vcmask 1043456   ;;  %v450_v4 = vld [vmem:[%s647_s2 + $0x8] ss:$0 sps:$4 sm:$0xff]   ;;  %v453_v8 = vld [vmem:[%s649_s4 + $0x10] sm:$0xff]  }
  0x13   :  { %401 = vmatprep.mubr.msk.bf16.mxu0 %vm493_vm0, %v492_v0  ;;  %421 = vmatprep.mubr.msk.bf16.mxu1 %vm493_vm0, %v492_v0  ;;  %44 = vst.msk [vmem:[#allocation2] sm:$0xff] %vm43_vm1, %v42_v2  ;;  %v449_v3 = vld [vmem:[%s647_s2] sm:$0xff]   ;;  %v79_v6 = vsel %vm77_vm2, %v450_v4, 0  ;;  %v452_v7 = vld [vmem:[%s649_s4 + $0x8] sm:$0xff]   ;;  %v454_v9 = vld [vmem:[%s649_s4 + $0x18] sm:$0xff]   ;;  %vm50_vm3 = vcmask 195712  }
  0x14   :  { %47 = vrot.lane.b32.xlu0 %v45_v1, %s494_s1  ;;  %398 = vmatpush3.bf16.msra.mxu0 %v449_v3  ;;  %v451_v5 = vld [vmem:[%s649_s4] sm:$0xff]   ;;  %v456_v11 = vld [vmem:[%s649_s4 + $0x28] sm:$0xff]   ;;  %vm73_vm4 = vcmask 195584   ;;  %v457_v15 = vld [vmem:[%s649_s4 + $0x30] sm:$0xff]   ;;  %vm347_vm5 = vcmask 15360  }
  0x15   :  { %399 = vmatprep.subr.bf16.mxu0 %v492_v0  ;;  %406 = vmatpush3.bf16.msra.mxu1 %v451_v5  ;;  %v455_v10 = vld [vmem:[%s649_s4 + $0x20] sm:$0xff]   ;;  %v458_v16 = vld [vmem:[%s649_s4 + $0x38] sm:$0xff]   ;;  %v460_v18 = vld [vmem:[%s651_s6 + $0x8] sm:$0xff]  }
  0x16   :  { %407 = vmatprep.subr.bf16.mxu1 %v492_v0  ;;  %v459_v17 = vld [vmem:[%s651_s6] sm:$0xff]   ;;  %v461_v19 = vld [vmem:[%s651_s6 + $0x10] sm:$0xff]   ;;  %v462_v20 = vld [vmem:[%s651_s6 + $0x18] sm:$0xff]  }
  0x17   :  { %v463_v21 = vld [vmem:[%s651_s6 + $0x20] sm:$0xff]   ;;  %v464_v22 = vld [vmem:[%s651_s6 + $0x28] sm:$0xff]   ;;  %v465_v31 = vld [vmem:[%s651_s6 + $0x30] sm:$0xff]  }
  0x18   :  { %400 = vmatpush3.bf16.msra.mxu0 %v79_v6  ;;  %v354_v23 = vld [vmem:[%s648_s3] ss:$0 sm:$0xff]  ;;  %v466_v32 = vld [vmem:[%s651_s6 + $0x38] sm:$0xff]  }
  0x19   :  { %425 = vmatprep.subr.bf16.mxu0 %v492_v0  ;;  %408 = vmatpush3.bf16.msra.mxu1 %v452_v7  ;;  %v358_v33 = vld [vmem:[%s650_s5] ss:$0 sm:$0xff] }
  0x1a   :  { %409 = vmatprep.subr.bf16.mxu1 %v492_v0  ;;  %v367_v41 = vld [vmem:[%s652_s7] ss:$0 sm:$0xff] }
  0x1d   :  { %410 = vmatpush3.bf16.msra.mxu1 %v453_v8 }
  0x1e   :  { %411 = vmatprep.subr.bf16.mxu1 %v492_v0 }
  0x21   :  { %412 = vmatpush3.bf16.msra.mxu1 %v454_v9 }
  0x22   :  { %413 = vmatprep.subr.bf16.mxu1 %v492_v0 }
  0x25   :  { %414 = vmatpush3.bf16.msra.mxu1 %v455_v10 }
  0x26   :  { %415 = vmatprep.subr.bf16.mxu1 %v492_v0 }
  0x29   :  { %416 = vmatpush3.bf16.msra.mxu1 %v456_v11 }
  0x2a   :  { %417 = vmatprep.subr.bf16.mxu1 %v492_v0 }
  0x2d   :  { %418 = vmatpush3.bf16.msra.mxu1 %v457_v15 }
  0x2e   :  { %419 = vmatprep.subr.bf16.mxu1 %v492_v0 }
  0x31   :  { %420 = vmatpush3.bf16.msra.mxu1 %v458_v16 }
  0x86   :  { %v48_v12 = vpop.permute.xlu0 %47 }
  0x87   :  { %51 = vst.msk [vmem:[#allocation2] sm:$0xff] %vm50_vm3, %v48_v12 }
  0x8e   :  { %v52_v13 = vld [vmem:[#allocation2] sm:$0xff] }
  0x8f   :  { %v53_v14 = vpack.c.bf16 %v52_v13, %v52_v13 }
  0x91   :  { %402 = vmatmul.mubr.msk.bf16.vlgmr.msra.gmra.mrb[0].mxu0 %vm73_vm4, %v53_v14 }
  0x92   :  { %441 = vmatprep.mubr.msk.bf16.mxu0 %vm493_vm0, %v492_v0  ;;  %426 = vmatpush3.bf16.msra.mxu0 %v459_v17 }
  0x93   :  { %427 = vmatprep.subr.bf16.mxu0 %v492_v0 }
  0x96   :  { %428 = vmatpush3.bf16.msra.mxu0 %v460_v18 }
  0x97   :  { %429 = vmatprep.subr.bf16.mxu0 %v492_v0 }
  0x9a   :  { %430 = vmatpush3.bf16.msra.mxu0 %v461_v19 }
  0x9b   :  { %431 = vmatprep.subr.bf16.mxu0 %v492_v0 }
  0x9e   :  { %432 = vmatpush3.bf16.msra.mxu0 %v462_v20 }
  0x9f   :  { %433 = vmatprep.subr.bf16.mxu0 %v492_v0 }
  0xa2   :  { %434 = vmatpush3.bf16.msra.mxu0 %v463_v21 }
  0xa3   :  { %435 = vmatprep.subr.bf16.mxu0 %v492_v0 }
  0xa6   :  { %436 = vmatpush3.bf16.msra.mxu0 %v464_v22 }
  0xa7   :  { %437 = vmatprep.subr.bf16.mxu0 %v492_v0 }
  0xaa   :  { %438 = vmatpush3.bf16.msra.mxu0 %v465_v31 }
  0xab   :  { %439 = vmatprep.subr.bf16.mxu0 %v492_v0 }
  0xae   :  { %440 = vmatpush3.bf16.msra.mxu0 %v466_v32 }
 0x164   :  { %v115_v24 = vpop.f32.mrb[0].mxu0 }
 0x165   :  { %v116_v25 = vadd.f32 %v354_v23, %v115_v24  ;;  %v403_v26 = vpop.f32.mrb[1].mxu0 }
 0x166   :  { %v118_v27 = vpop.f32.mrb[2].mxu0 }
 0x167   :  { %v121_v28 = vmax.f32 %v116_v25, 0.0  ;;  %v404_v29 = vpop.f32.mrb[3].mxu0 }
 0x169   :  { %v122_v30 = vpack.c.bf16 %v121_v28, %v121_v28 }
 0x16b   :  { %422 = vmatmul.mubr.bf16.vlgmr.msra.gmra.mrb[0].mxu1 %v122_v30 }
 0x23e   :  { %v228_v34 = vpop.f32.mrb[0].mxu1 }
 0x23f   :  { %v229_v35 = vadd.f32 %v358_v33, %v228_v34  ;;  %v423_v36 = vpop.f32.mrb[1].mxu1 }
 0x240   :  { %v231_v37 = vpop.f32.mrb[2].mxu1 }
 0x241   :  { %v234_v38 = vmax.f32 %v229_v35, 0.0  ;;  %v424_v39 = vpop.f32.mrb[3].mxu1 }
 0x243   :  { %v235_v40 = vpack.c.bf16 %v234_v38, %v234_v38 }
 0x245   :  { %442 = vmatmul.mubr.bf16.vlgmr.msra.gmra.mrb[4].mxu0 %v235_v40 }
 0x318   :  { %v341_v42 = vpop.f32.mrb[4].mxu0 }
 0x319   :  { %v342_v43 = vadd.f32 %v367_v41, %v341_v42  ;;  %v443_v44 = vpop.f32.mrb[5].mxu0 }
 0x31a   :  { %v344_v45 = vpop.f32.mrb[6].mxu0 }
 0x31b   :  { %348 = vst.msk [vmem:[%s653_s8] sm:$0xff] %vm347_vm5, %v342_v43  ;;  %v444_v46 = vpop.f32.mrb[7].mxu0 }
 0x31c   :  { %353 = vsyncpa [#allocation4], 1 }

</bundles_post_ra>
